<compile_context>
chip_gen: v5e
topology: v5e:2x2
jax: 0.10.0
libtpu: 0.0.40
codegen_flags: <defaults>
</compile_context>

<pallas_src>
import jax
import jax.numpy as jnp
from jax import lax
from jax.experimental import pallas as pl
from jax.experimental.pallas import tpu as pltpu

INPUT_SIZE = 95
HIDDEN_SIZE = 32
MID_SIZE = 16
NUM_CLASSES = 1
F_PAD = 128  # contraction dim padded to the 128-lane vreg width


def _leaky_relu(x, slope=0.01):
    return jnp.where(x >= 0, x, slope * x)


def _col_normalize_slices(h2d, tb, s, width):
    """Per-slice, per-column standardization (unbiased std over the S rows of
    each (S, width) slice), operating on the flattened (tb*s, width) matrix."""
    h3 = h2d.reshape(tb, s, width)
    mean = jnp.mean(h3, axis=1, keepdims=True)
    diff = h3 - mean
    var = jnp.sum(diff * diff, axis=1, keepdims=True) * (1.0 / (s - 1))
    # NOTE: rsqrt(0) -> Inf/NaN for constant columns; the PyTorch reference
    # divides by std=0 and NaNs identically, so no eps is added here.
    inv_std = lax.rsqrt(var)
    return (diff * inv_std).reshape(tb * s, width)


def net_kernel(x_ref, w1_ref, b1_ref, w2_ref, b2_ref, w4_ref, o_ref):
    tb, s, f = x_ref.shape
    m = tb * s

    # Flatten the (TB, S, F) block into one big (TB*S, F) operand so every
    # layer is a single properly-shaped MXU matmul.
    x = x_ref[...].reshape(m, f)

    # fc1 + LeakyReLU + per-slice Normalization
    h = jnp.dot(x, w1_ref[...], preferred_element_type=jnp.float32) + b1_ref[...]
    h = _leaky_relu(h)
    h = _col_normalize_slices(h, tb, s, HIDDEN_SIZE)
    # (dropout1: identity in eval mode)

    # fc2 + LeakyReLU + per-slice Normalization
    h = jnp.dot(h, w2_ref[...], preferred_element_type=jnp.float32) + b2_ref[...]
    h = _leaky_relu(h)
    h = _col_normalize_slices(h, tb, s, MID_SIZE)
    # (dropout2: identity in eval mode)

    # fc4 (no bias): contract w4 (1, 16) against the rows of h (M, 16) so the
    # result is produced directly as a lane-dense (1, M) row — no in-kernel
    # transpose / column->row relayout needed.
    out = lax.dot_general(
        w4_ref[...], h,
        dimension_numbers=(((1,), (1,)), ((), ())),
        preferred_element_type=jnp.float32,
    )  # (1, TB*S)
    o_ref[0] = out.astype(o_ref.dtype)


def net_forward(x, params, *, block_b=512):
    """x: (B, S, INPUT_SIZE) float32. Returns (B, S, NUM_CLASSES).

    block_b: batch slices per grid step.  512 keeps the double-buffered input
    block at ~4 MiB (fits the scoped-VMEM default on v5e/v6e/v7x) while giving
    M = block_b*S = 4096 rows per matmul (multiple of 256 for the v6e/v7x MXU,
    of 128 for v5e).  Raise towards 1024-2048 on v6e if desired.
    """
    w1, b1, w2, b2, w4 = params
    B, S, F = x.shape
    assert F == INPUT_SIZE
    assert S >= 2, "unbiased std needs at least 2 rows per slice"

    tb = min(block_b, B)
    nblocks = pl.cdiv(B, tb)
    b_pad = nblocks * tb

    xp = x
    if b_pad != B:
        # Edge-replicate the last slice: padded slices normalize cleanly (no
        # NaNs) and are sliced off after the kernel.
        xp = jnp.pad(xp, ((0, b_pad - B), (0, 0), (0, 0)), mode="edge")
    # Zero-pad the contraction dim 95 -> 128 (matching zero rows in w1_t).
    xp = jnp.pad(xp, ((0, 0), (0, 0), (0, F_PAD - F)))

    # Pre-transpose / pad weights in JAX (free layout plumbing).
    w1_t = jnp.pad(w1.T, ((0, F_PAD - F), (0, 0)))   # (128, HIDDEN)
    w2_t = w2.T                                       # (HIDDEN, MID)
    b1_r = b1.reshape(1, HIDDEN_SIZE)
    b2_r = b2.reshape(1, MID_SIZE)
    w4_r = w4.reshape(NUM_CLASSES, MID_SIZE)          # used as-is (rhs-transposed dot)

    m_blk = tb * S
    out = pl.pallas_call(
        net_kernel,
        out_shape=jax.ShapeDtypeStruct((nblocks, 1, m_blk), jnp.float32),
        grid_spec=pltpu.PrefetchScalarGridSpec(
            num_scalar_prefetch=0,
            grid=(nblocks,),
            in_specs=[
                pl.BlockSpec((tb, S, F_PAD), lambda b: (b, 0, 0)),
                pl.BlockSpec((F_PAD, HIDDEN_SIZE), lambda b: (0, 0)),
                pl.BlockSpec((1, HIDDEN_SIZE), lambda b: (0, 0)),
                pl.BlockSpec((HIDDEN_SIZE, MID_SIZE), lambda b: (0, 0)),
                pl.BlockSpec((1, MID_SIZE), lambda b: (0, 0)),
                pl.BlockSpec((NUM_CLASSES, MID_SIZE), lambda b: (0, 0)),
            ],
            out_specs=pl.BlockSpec((1, 1, m_blk), lambda b: (b, 0, 0)),
        ),
        compiler_params=pltpu.CompilerParams(
            # Parallel batch axis -> both TensorCores on v7x; no-op on v5e/v6e.
            dimension_semantics=("parallel",),
        ),
    )(xp, w1_t, b1_r, w2_t, b2_r, w4_r)

    out = out.reshape(b_pad, S)[:B]
    return out[..., None]  # (B, S, NUM_CLASSES)


def init_params(key):
    """Deterministic parameter init (uniform, roughly like PyTorch Linear defaults)."""
    k1, k2, k3, k4, k5 = jax.random.split(key, 5)
    lim1 = 1.0 / (INPUT_SIZE ** 0.5)
    lim2 = 1.0 / (HIDDEN_SIZE ** 0.5)
    lim4 = 1.0 / (MID_SIZE ** 0.5)
    w1 = jax.random.uniform(k1, (HIDDEN_SIZE, INPUT_SIZE), jnp.float32, -lim1, lim1)
    b1 = jax.random.uniform(k2, (HIDDEN_SIZE,), jnp.float32, -lim1, lim1)
    w2 = jax.random.uniform(k3, (MID_SIZE, HIDDEN_SIZE), jnp.float32, -lim2, lim2)
    b2 = jax.random.uniform(k4, (MID_SIZE,), jnp.float32, -lim2, lim2)
    w4 = jax.random.uniform(k5, (NUM_CLASSES, MID_SIZE), jnp.float32, -lim4, lim4)
    return (w1, b1, w2, b2, w4)


def reference_forward(x, params):
    """Pure-JAX reference matching the PyTorch forward (eval mode)."""
    w1, b1, w2, b2, w4 = params

    def norm(h):
        mean = jnp.mean(h, axis=1, keepdims=True)
        std = jnp.std(h, axis=1, keepdims=True, ddof=1)
        return (h - mean) / std

    h = x @ w1.T + b1
    h = jnp.where(h >= 0, h, 0.01 * h)
    h = norm(h)
    h = h @ w2.T + b2
    h = jnp.where(h >= 0, h, 0.01 * h)
    h = norm(h)
    return h @ w4.T


if __name__ == "__main__":
    key = jax.random.PRNGKey(0)
    pkey, xkey, xkey2 = jax.random.split(key, 3)
    params = init_params(pkey)

    # Small primary check (single block).
    B, S = 2, 8
    x = jax.random.normal(xkey, (B, S, INPUT_SIZE), jnp.float32)
    out = jax.block_until_ready(net_forward(x, params))
    ref = reference_forward(x, params)
    assert out.shape == (B, S, NUM_CLASSES)
    assert jnp.allclose(out, ref, atol=1e-4, rtol=1e-4), (
        f"mismatch: max abs err {jnp.max(jnp.abs(out - ref))}"
    )

    # Secondary check exercising multi-block grid + batch-tail padding.
    B2 = 5
    x2 = jax.random.normal(xkey2, (B2, S, INPUT_SIZE), jnp.float32)
    out2 = jax.block_until_ready(net_forward(x2, params, block_b=2))
    ref2 = reference_forward(x2, params)
    assert out2.shape == (B2, S, NUM_CLASSES)
    assert jnp.allclose(out2, ref2, atol=1e-4, rtol=1e-4), (
        f"mismatch (multi-block): max abs err {jnp.max(jnp.abs(out2 - ref2))}"
    )

    print("KERNEL_OK")
</pallas_src>

<mosaic_0001>
module attributes {stable_mosaic.version = 11 : i64} {
  func.func @net_kernel(%arg0: i32, %arg1: memref<2x8x128xf32, #tpu.memory_space<vmem>>, %arg2: memref<128x32xf32, #tpu.memory_space<vmem>>, %arg3: memref<1x32xf32, #tpu.memory_space<vmem>>, %arg4: memref<32x16xf32, #tpu.memory_space<vmem>>, %arg5: memref<1x16xf32, #tpu.memory_space<vmem>>, %arg6: memref<1x16xf32, #tpu.memory_space<vmem>>, %arg7: memref<1x1x16xf32, #tpu.memory_space<vmem>>) attributes {dimension_semantics = [#tpu.dimension_semantics<parallel>], iteration_bounds = array<i64: 1>, scalar_prefetch = 0 : i64, scratch_operands = 0 : i64, tpu.core_type = #tpu.core_type<tc>, window_params = [{transform_indices = @transform_0, window_bounds = array<i64: 2, 8, 128>}, {pipeline_mode = #tpu.pipeline_mode<synchronous>, transform_indices = @transform_1, window_bounds = array<i64: 128, 32>}, {pipeline_mode = #tpu.pipeline_mode<synchronous>, transform_indices = @transform_2, window_bounds = array<i64: 1, 32>}, {pipeline_mode = #tpu.pipeline_mode<synchronous>, transform_indices = @transform_3, window_bounds = array<i64: 32, 16>}, {pipeline_mode = #tpu.pipeline_mode<synchronous>, transform_indices = @transform_4, window_bounds = array<i64: 1, 16>}, {pipeline_mode = #tpu.pipeline_mode<synchronous>, transform_indices = @transform_5, window_bounds = array<i64: 1, 16>}, {transform_indices = @transform_6, window_bounds = array<i64: 1, 1, 16>}]} {
    %c0 = arith.constant 0 : index
    %c0_0 = arith.constant 0 : index
    %c0_1 = arith.constant 0 : index
    %0 = vector.load %arg1[%c0, %c0_0, %c0_1] : memref<2x8x128xf32, #tpu.memory_space<vmem>>, vector<2x8x128xf32>
    %1 = vector.shape_cast %0 : vector<2x8x128xf32> to vector<16x128xf32>
    %c0_2 = arith.constant 0 : index
    %c0_3 = arith.constant 0 : index
    %2 = vector.load %arg2[%c0_2, %c0_3] : memref<128x32xf32, #tpu.memory_space<vmem>>, vector<128x32xf32>
    %cst = arith.constant dense<0.000000e+00> : vector<16x32xf32>
    %3 = tpu.matmul %1, %2, %cst {dimension_numbers = #tpu.dot_dimension_numbers<[1], [0], [0], [1], [0, 0, 1, 1], [], []>} : vector<16x128xf32>, vector<128x32xf32>, vector<16x32xf32> -> vector<16x32xf32>
    %c0_4 = arith.constant 0 : index
    %c0_5 = arith.constant 0 : index
    %4 = vector.load %arg3[%c0_4, %c0_5] : memref<1x32xf32, #tpu.memory_space<vmem>>, vector<1x32xf32>
    %5 = vector.broadcast %4 : vector<1x32xf32> to vector<16x32xf32>
    %6 = arith.addf %3, %5 : vector<16x32xf32>
    %cst_6 = arith.constant 0.000000e+00 : f32
    %7 = vector.broadcast %cst_6 : f32 to vector<16x32xf32>
    %8 = arith.cmpf oge, %6, %7 : vector<16x32xf32>
    %cst_7 = arith.constant 0.00999999977 : f32
    %9 = vector.broadcast %cst_7 : f32 to vector<16x32xf32>
    %10 = arith.mulf %9, %6 : vector<16x32xf32>
    %11 = arith.select %8, %6, %10 : vector<16x32xi1>, vector<16x32xf32>
    %12 = vector.shape_cast %11 : vector<16x32xf32> to vector<2x8x32xf32>
    %cst_8 = arith.constant dense<0.000000e+00> : vector<2x32xf32>
    %13 = vector.multi_reduction <add>, %12, %cst_8 [1] : vector<2x8x32xf32> to vector<2x32xf32>
    %14 = vector.shape_cast %13 : vector<2x32xf32> to vector<2x1x32xf32>
    %cst_9 = arith.constant 8.000000e+00 : f32
    %15 = vector.broadcast %cst_9 : f32 to vector<2x1x32xf32>
    %16 = arith.divf %14, %15 : vector<2x1x32xf32>
    %17 = vector.broadcast %16 : vector<2x1x32xf32> to vector<2x8x32xf32>
    %18 = arith.subf %12, %17 : vector<2x8x32xf32>
    %19 = arith.mulf %18, %18 : vector<2x8x32xf32>
    %cst_10 = arith.constant dense<0.000000e+00> : vector<2x32xf32>
    %20 = vector.multi_reduction <add>, %19, %cst_10 [1] : vector<2x8x32xf32> to vector<2x32xf32>
    %21 = vector.shape_cast %20 : vector<2x32xf32> to vector<2x1x32xf32>
    %cst_11 = arith.constant 0.142857149 : f32
    %22 = vector.broadcast %cst_11 : f32 to vector<2x1x32xf32>
    %23 = arith.mulf %21, %22 : vector<2x1x32xf32>
    %24 = math.rsqrt %23 : vector<2x1x32xf32>
    %25 = vector.broadcast %24 : vector<2x1x32xf32> to vector<2x8x32xf32>
    %26 = arith.mulf %18, %25 : vector<2x8x32xf32>
    %27 = vector.shape_cast %26 : vector<2x8x32xf32> to vector<16x32xf32>
    %c0_12 = arith.constant 0 : index
    %c0_13 = arith.constant 0 : index
    %28 = vector.load %arg4[%c0_12, %c0_13] : memref<32x16xf32, #tpu.memory_space<vmem>>, vector<32x16xf32>
    %cst_14 = arith.constant dense<0.000000e+00> : vector<16x16xf32>
    %29 = tpu.matmul %27, %28, %cst_14 {dimension_numbers = #tpu.dot_dimension_numbers<[1], [0], [0], [1], [0, 0, 1, 1], [], []>} : vector<16x32xf32>, vector<32x16xf32>, vector<16x16xf32> -> vector<16x16xf32>
    %c0_15 = arith.constant 0 : index
    %c0_16 = arith.constant 0 : index
    %30 = vector.load %arg5[%c0_15, %c0_16] : memref<1x16xf32, #tpu.memory_space<vmem>>, vector<1x16xf32>
    %31 = vector.broadcast %30 : vector<1x16xf32> to vector<16x16xf32>
    %32 = arith.addf %29, %31 : vector<16x16xf32>
    %cst_17 = arith.constant 0.000000e+00 : f32
    %33 = vector.broadcast %cst_17 : f32 to vector<16x16xf32>
    %34 = arith.cmpf oge, %32, %33 : vector<16x16xf32>
    %cst_18 = arith.constant 0.00999999977 : f32
    %35 = vector.broadcast %cst_18 : f32 to vector<16x16xf32>
    %36 = arith.mulf %35, %32 : vector<16x16xf32>
    %37 = arith.select %34, %32, %36 : vector<16x16xi1>, vector<16x16xf32>
    %38 = vector.shape_cast %37 : vector<16x16xf32> to vector<2x8x16xf32>
    %cst_19 = arith.constant dense<0.000000e+00> : vector<2x16xf32>
    %39 = vector.multi_reduction <add>, %38, %cst_19 [1] : vector<2x8x16xf32> to vector<2x16xf32>
    %40 = vector.shape_cast %39 : vector<2x16xf32> to vector<2x1x16xf32>
    %cst_20 = arith.constant 8.000000e+00 : f32
    %41 = vector.broadcast %cst_20 : f32 to vector<2x1x16xf32>
    %42 = arith.divf %40, %41 : vector<2x1x16xf32>
    %43 = vector.broadcast %42 : vector<2x1x16xf32> to vector<2x8x16xf32>
    %44 = arith.subf %38, %43 : vector<2x8x16xf32>
    %45 = arith.mulf %44, %44 : vector<2x8x16xf32>
    %cst_21 = arith.constant dense<0.000000e+00> : vector<2x16xf32>
    %46 = vector.multi_reduction <add>, %45, %cst_21 [1] : vector<2x8x16xf32> to vector<2x16xf32>
    %47 = vector.shape_cast %46 : vector<2x16xf32> to vector<2x1x16xf32>
    %cst_22 = arith.constant 0.142857149 : f32
    %48 = vector.broadcast %cst_22 : f32 to vector<2x1x16xf32>
    %49 = arith.mulf %47, %48 : vector<2x1x16xf32>
    %50 = math.rsqrt %49 : vector<2x1x16xf32>
    %51 = vector.broadcast %50 : vector<2x1x16xf32> to vector<2x8x16xf32>
    %52 = arith.mulf %44, %51 : vector<2x8x16xf32>
    %53 = vector.shape_cast %52 : vector<2x8x16xf32> to vector<16x16xf32>
    %c0_23 = arith.constant 0 : index
    %c0_24 = arith.constant 0 : index
    %54 = vector.load %arg6[%c0_23, %c0_24] : memref<1x16xf32, #tpu.memory_space<vmem>>, vector<1x16xf32>
    %cst_25 = arith.constant dense<0.000000e+00> : vector<1x16xf32>
    %55 = tpu.matmul %54, %53, %cst_25 {dimension_numbers = #tpu.dot_dimension_numbers<[1], [1], [0], [0], [0, 0, 1, 0], [], []>} : vector<1x16xf32>, vector<16x16xf32>, vector<1x16xf32> -> vector<1x16xf32>
    %c0_26 = arith.constant 0 : index
    %c0_27 = arith.constant 0 : index
    %c0_28 = arith.constant 0 : index
    %56 = vector.load %arg7[%c0_26, %c0_27, %c0_28] : memref<1x1x16xf32, #tpu.memory_space<vmem>>, vector<1x1x16xf32>
    %57 = vector.shape_cast %56 : vector<1x1x16xf32> to vector<1x16xf32>
    %58 = vector.shape_cast %55 : vector<1x16xf32> to vector<1x1x16xf32>
    tpu.vector_store %arg7[%c0_26, %c0_27, %c0_28], %58 {strides = array<i32>} : memref<1x1x16xf32, #tpu.memory_space<vmem>>, vector<1x1x16xf32>,
    return
  }
  func.func @transform_0(%arg0: i32) -> (i32, i32, i32) {
    %c0_i32 = arith.constant 0 : i32
    %c0_i32_0 = arith.constant 0 : i32
    %c0_i32_1 = arith.constant 0 : i32
    return %arg0, %c0_i32, %c0_i32_0 : i32, i32, i32
  }
  func.func @transform_1(%arg0: i32) -> (i32, i32) {
    %c0_i32 = arith.constant 0 : i32
    %c0_i32_0 = arith.constant 0 : i32
    %c0_i32_1 = arith.constant 0 : i32
    return %c0_i32, %c0_i32_0 : i32, i32
  }
  func.func @transform_2(%arg0: i32) -> (i32, i32) {
    %c0_i32 = arith.constant 0 : i32
    %c0_i32_0 = arith.constant 0 : i32
    %c0_i32_1 = arith.constant 0 : i32
    return %c0_i32, %c0_i32_0 : i32, i32
  }
  func.func @transform_3(%arg0: i32) -> (i32, i32) {
    %c0_i32 = arith.constant 0 : i32
    %c0_i32_0 = arith.constant 0 : i32
    %c0_i32_1 = arith.constant 0 : i32
    return %c0_i32, %c0_i32_0 : i32, i32
  }
  func.func @transform_4(%arg0: i32) -> (i32, i32) {
    %c0_i32 = arith.constant 0 : i32
    %c0_i32_0 = arith.constant 0 : i32
    %c0_i32_1 = arith.constant 0 : i32
    return %c0_i32, %c0_i32_0 : i32, i32
  }
  func.func @transform_5(%arg0: i32) -> (i32, i32) {
    %c0_i32 = arith.constant 0 : i32
    %c0_i32_0 = arith.constant 0 : i32
    %c0_i32_1 = arith.constant 0 : i32
    return %c0_i32, %c0_i32_0 : i32, i32
  }
  func.func @transform_6(%arg0: i32) -> (i32, i32, i32) {
    %c0_i32 = arith.constant 0 : i32
    %c0_i32_0 = arith.constant 0 : i32
    %c0_i32_1 = arith.constant 0 : i32
    return %arg0, %c0_i32, %c0_i32_0 : i32, i32, i32
  }
}

</mosaic_0001>

<bundles_post_ra>
// kernel: tpu_custom_call.1
= control target key start
LH: loop header
LB: loop body
LE: loop exit
PB: predicated region body
PF: predicated region fallthrough
CT: control target
= control target key end

     0   :  { %s486_s0 = inlined_call_operand.vmem [shape: f32[2,8,128], index: 0, kind: input, shape index: {}]   ;;  %s487_s1 = inlined_call_operand.vmem [shape: f32[128,32], index: 1, kind: input, shape index: {}]   ;;  %s488_s2 = inlined_call_operand.vmem [shape: f32[1,32], index: 2, kind: input, shape index: {}]   ;;  %s489_s3 = inlined_call_operand.vmem [shape: f32[32,16], index: 3, kind: input, shape index: {}]   ;;  %s490_s4 = inlined_call_operand.vmem [shape: f32[1,16], index: 4, kind: input, shape index: {}]   ;;  %s491_s5 = inlined_call_operand.vmem [shape: f32[1,16], index: 5, kind: input, shape index: {}]   ;;  %s492_s6 = inlined_call_operand.hbm [shape: f32[1,1,16], index: 6, kind: output, shape index: {}]  }
   0x1   :  { %v41_v0 = vld [vmem:[%s487_s1 + $0x78] sm:$0xff]  ;;  %v40_v1 = vld [vmem:[%s487_s1 + $0x70] sm:$0xff]  ;;  %v39_v2 = vld [vmem:[%s487_s1 + $0x68] sm:$0xff] }
   0x2   :  { %46 = vmatpush.msra.mxu0 %v41_v0  ;;  %296 = vmatpush.msra.mxu3 %v41_v0  ;;  %v38_v3 = vld [vmem:[%s487_s1 + $0x60] sm:$0xff]  ;;  %v37_v4 = vld [vmem:[%s487_s1 + $0x58] sm:$0xff] }
   0x4   :  { %47 = vmatpush.msra.mxu0 %v40_v1  ;;  %297 = vmatpush.msra.mxu3 %v40_v1 }
   0x6   :  { %48 = vmatpush.msra.mxu0 %v39_v2  ;;  %298 = vmatpush.msra.mxu3 %v39_v2 }
   0x8   :  { %49 = vmatpush.msra.mxu0 %v38_v3  ;;  %299 = vmatpush.msra.mxu3 %v38_v3 }
   0x9   :  { %11 = vsyncpa [#allocation3], 0  ;;  %v36_v5 = vld [vmem:[%s487_s1 + $0x50] sm:$0xff]  ;;  %v35_v6 = vld [vmem:[%s487_s1 + $0x48] sm:$0xff]  ;;  %v352_v21 = vmov 8.0   ;;  %vm75_vm1 = vcmask 261120  }
   0xa   :  { %50 = vmatpush.msra.mxu0 %v37_v4  ;;  %300 = vmatpush.msra.mxu3 %v37_v4  ;;  %v34_v7 = vld [vmem:[%s487_s1 + $0x40] sm:$0xff]  ;;  %v33_v8 = vld [vmem:[%s487_s1 + $0x38] sm:$0xff]  ;;  %v32_v9 = vld [vmem:[%s487_s1 + $0x30] sm:$0xff]  ;;  %316 = vrcp.f32 %v352_v21  ;;  %vm184_vm11 = vcmask 130048   ;;  %s353_s18 = smov [#allocation2]   ;;  %s282_s22 = sshll.u32 %s492_s6, 4  ;;  %s283_s22 = int_to_ptr.hbm [resolvable:$true] %s282_s22 }
   0xb   :  { %v31_v10 = vld [vmem:[%s487_s1 + $0x28] sm:$0xff]  ;;  %v30_v11 = vld [vmem:[%s487_s1 + $0x20] sm:$0xff]  ;;  %v29_v12 = vld [vmem:[%s487_s1 + $0x18] sm:$0xff]  ;;  %s280_s19 = sshll.u32 %s353_s18, 4  ;;  %s281_s19 = int_to_ptr.vmem [resolvable:$true] %s280_s19 }
   0xc   :  { %51 = vmatpush.msra.mxu0 %v36_v5  ;;  %301 = vmatpush.msra.mxu3 %v36_v5  ;;  %v28_v13 = vld [vmem:[%s487_s1 + $0x10] sm:$0xff]  ;;  %v27_v14 = vld [vmem:[%s487_s1 + $0x8] sm:$0xff]  ;;  %v26_v15 = vld [vmem:[%s487_s1] sm:$0xff] }
   0xd   :  { %v24_v16 = vld [vmem:[%s486_s0] sm:$0xff]  ;;  %v25_v17 = vld [vmem:[%s486_s0 + $0x8] sm:$0xff]  ;;  %v144_v18 = vld [vmem:[%s489_s3 + $0x18] sm:$0xff] }
   0xe   :  { %52 = vmatpush.msra.mxu0 %v35_v6  ;;  %302 = vmatpush.msra.mxu3 %v35_v6  ;;  %v143_v19 = vld [vmem:[%s489_s3 + $0x10] sm:$0xff]  ;;  %v142_v20 = vld [vmem:[%s489_s3 + $0x8] sm:$0xff]  ;;  %v141_v22 = vld [vmem:[%s489_s3] sm:$0xff] }
   0xf   :  { %167 = vmatpush.msra.mxu1 %v144_v18  ;;  %v314_v24 = vld [vmem:[%s488_s2] ss:$0 sm:$0xff] }
  0x10   :  { %53 = vmatpush.msra.mxu0 %v34_v7  ;;  %303 = vmatpush.msra.mxu3 %v34_v7  ;;  %v317_v23 = vpop.eup %316 }
  0x11   :  { %168 = vmatpush.msra.mxu1 %v143_v19  ;;  %v91_v26 = vmul.f32 8.0, %v317_v23  ;;  %vm95_vm3 = vweird.f32 %v317_v23 }
  0x12   :  { %54 = vmatpush.msra.mxu0 %v33_v8  ;;  %304 = vmatpush.msra.mxu3 %v33_v8 }
  0x13   :  { %169 = vmatpush.msra.mxu1 %v142_v20  ;;  %v92_v29 = vsub.f32 1.0, %v91_v26  ;;  %v315_v26 = vld [vmem:[%s490_s4] ss:$0 sm:$0xff] }
  0x14   :  { %55 = vmatpush.msra.mxu0 %v32_v9  ;;  %305 = vmatpush.msra.mxu3 %v32_v9 }
  0x15   :  { %170 = vmatpush.msra.mxu1 %v141_v22  ;;  %v93_v35 = vmul.f32 %v317_v23, %v92_v29 }
  0x16   :  { %56 = vmatpush.msra.mxu0 %v31_v10  ;;  %306 = vmatpush.msra.mxu3 %v31_v10 }
  0x17   :  { %v94_v41 = vadd.f32 %v317_v23, %v93_v35 }
  0x18   :  { %57 = vmatpush.msra.mxu0 %v30_v11  ;;  %307 = vmatpush.msra.mxu3 %v30_v11 }
  0x19   :  { %v460_v46 = vsel %vm95_vm3, %v317_v23, %v94_v41  ;;  %vm273_vm3 = vcmask 122880  }
  0x1a   :  { %58 = vmatpush.msra.mxu0 %v29_v12  ;;  %308 = vmatpush.msra.mxu3 %v29_v12 }
  0x1c   :  { %59 = vmatpush.msra.mxu0 %v28_v13  ;;  %309 = vmatpush.msra.mxu3 %v28_v13 }
  0x1e   :  { %60 = vmatpush.msra.mxu0 %v27_v14  ;;  %310 = vmatpush.msra.mxu3 %v27_v14 }
  0x20   :  { %61 = vmatpush.msra.mxu0 %v26_v15  ;;  %311 = vmatpush.msra.mxu3 %v26_v15 }
  0x21   :  { %62 = vmatmul.f32.vlgmr.msra.gmra.mxu0 %v24_v16  ;;  %65 = vmatmul.f32.vlgmr.msra.gmra.mxu3 %v25_v17 }
  0x9e   :  { %v63_v25 = vpop.f32.mrf.mxu0 }
  0x9f   :  { %v64_v27 = vadd.f32 %v314_v24, %v63_v25 }
  0xa1   :  { %vm69_vm0 = vcmp.ge.f32.partialorder %v64_v27, 0.0  ;;  %v71_v28 = vmul.f32 0.01, %v64_v27 }
  0xa3   :  { %v73_v30 = vsel %vm69_vm0, %v64_v27, %v71_v28 }
  0xa4   :  { %v76_v31 = vsel %vm75_vm1, %v73_v30, 0.0  ;;  %v66_v32 = vpop.f32.mrf.mxu3 }
  0xa5   :  { %v77_v33 = vrot.slane %v76_v31, 4  ;;  %v67_v34 = vadd.f32 %v314_v24, %v66_v32 }
  0xa7   :  { %v78_v36 = vadd.f32 %v77_v33, %v76_v31  ;;  %vm70_vm2 = vcmp.ge.f32.partialorder %v67_v34, 0.0  ;;  %v72_v37 = vmul.f32 0.01, %v67_v34 }
  0xa9   :  { %v79_v38 = vrot.slane %v78_v36, 2  ;;  %v74_v39 = vsel %vm70_vm2, %v67_v34, %v72_v37 }
  0xaa   :  { %v83_v40 = vsel %vm75_vm1, %v74_v39, 0.0 }
  0xab   :  { %v80_v42 = vadd.f32 %v79_v38, %v78_v36  ;;  %v84_v43 = vrot.slane %v83_v40, 4 }
  0xad   :  { %v81_v44 = vrot.slane %v80_v42, 1  ;;  %v85_v45 = vadd.f32 %v84_v43, %v83_v40 }
  0xaf   :  { %v86_v47 = vrot.slane %v85_v45, 2  ;;  %v82_v48 = vadd.f32 %v81_v44, %v80_v42 }
  0xb1   :  { %v87_v49 = vadd.f32 %v86_v47, %v85_v45  ;;  %v97_v50 = vmul.f32 %v460_v46, %v82_v48 }
  0xb3   :  { %v88_v51 = vrot.slane %v87_v49, 1  ;;  %v99_v52 = vsub.f32 %v73_v30, %v97_v50 }
  0xb5   :  { %v101_v53 = vmul.f32 %v99_v52, %v99_v52  ;;  %v89_v54 = vadd.f32 %v88_v51, %v87_v49 }
  0xb7   :  { %v103_v55 = vsel %vm75_vm1, %v101_v53, 0.0  ;;  %v98_v56 = vmul.f32 %v460_v46, %v89_v54 }
  0xb8   :  { %v104_v57 = vrot.slane %v103_v55, 4 }
  0xb9   :  { %v100_v58 = vsub.f32 %v74_v39, %v98_v56 }
  0xba   :  { %v105_v59 = vadd.f32 %v104_v57, %v103_v55 }
  0xbb   :  { %v102_v60 = vmul.f32 %v100_v58, %v100_v58 }
  0xbc   :  { %v106_v61 = vrot.slane %v105_v59, 2 }
  0xbd   :  { %v110_v62 = vsel %vm75_vm1, %v102_v60, 0.0 }
  0xbe   :  { %v107_v63 = vadd.f32 %v106_v61, %v105_v59  ;;  %v111_v0 = vrot.slane %v110_v62, 4 }
  0xc0   :  { %v108_v1 = vrot.slane %v107_v63, 1  ;;  %v112_v2 = vadd.f32 %v111_v0, %v110_v62 }
  0xc2   :  { %v109_v3 = vadd.f32 %v108_v1, %v107_v63  ;;  %v113_v4 = vrot.slane %v112_v2, 2 }
  0xc4   :  { %v117_v5 = vmul.f32 0.14285715, %v109_v3  ;;  %v114_v6 = vadd.f32 %v113_v4, %v112_v2 }
  0xc6   :  { %318 = vrsqrt.f32 %v117_v5  ;;  %v115_v7 = vrot.slane %v114_v6, 1  ;;  %vm125_vm5 = vweird.f32 %v117_v5 }
  0xc8   :  { %v116_v8 = vadd.f32 %v115_v7, %v114_v6 }
  0xca   :  { %v118_v9 = vmul.f32 0.14285715, %v116_v8 }
  0xcc   :  { %v319_v10 = vpop.eup %318  ;;  %320 = vrsqrt.f32 %v118_v9  ;;  %vm135_vm8 = vweird.f32 %v118_v9 }
  0xcd   :  { %v120_v11 = vmul.f32 %v319_v10, %v117_v5  ;;  %vm126_vm4 = vweird.f32 %v319_v10 }
  0xce   :  { %vm127_vm6 = vmor %vm125_vm5, %vm126_vm4 }
  0xcf   :  { %v121_v12 = vmul.f32 %v319_v10, %v120_v11 }
  0xd1   :  { %v122_v13 = vmul.f32 0.5, %v121_v12 }
  0xd2   :  { %v321_v14 = vpop.eup %320 }
  0xd3   :  { %v123_v15 = vsub.f32 1.5, %v122_v13  ;;  %v130_v16 = vmul.f32 %v321_v14, %v118_v9  ;;  %vm136_vm7 = vweird.f32 %v321_v14 }
  0xd4   :  { %vm137_vm9 = vmor %vm135_vm8, %vm136_vm7 }
  0xd5   :  { %v124_v17 = vmul.f32 %v319_v10, %v123_v15  ;;  %v131_v18 = vmul.f32 %v321_v14, %v130_v16 }
  0xd7   :  { %v128_v19 = vsel %vm127_vm6, %v319_v10, %v124_v17  ;;  %v132_v20 = vmul.f32 0.5, %v131_v18 }
  0xd8   :  { %v139_v21 = vmul.f32 %v128_v19, %v99_v52 }
  0xd9   :  { %v133_v22 = vsub.f32 1.5, %v132_v20 }
  0xda   :  { %291 = vmatmul.msk.f32.vlgmr.msra.gmra.mxu1 %vm75_vm1, %v139_v21 }
  0xdb   :  { %v134_v23 = vmul.f32 %v321_v14, %v133_v22 }
  0xdd   :  { %v138_v24 = vsel %vm137_vm9, %v321_v14, %v134_v23  ;;  %v243_v23 = vld [vmem:[%s491_s5] sm:$0x1] }
  0xde   :  { %v140_v25 = vmul.f32 %v138_v24, %v100_v58 }
  0xe2   :  { %292 = vmatmul.msk.f32.gmra.mxu1 %vm75_vm1, %v140_v25 }
 0x157   :  { %v172_v27 = vpop.f32.mrf.mxu1 }
 0x158   :  { %v173_v28 = vadd.f32 %v315_v26, %v172_v27 }
 0x15a   :  { %vm178_vm10 = vcmp.ge.f32.partialorder %v173_v28, 0.0  ;;  %v180_v29 = vmul.f32 0.01, %v173_v28 }
 0x15c   :  { %v182_v30 = vsel %vm178_vm10, %v173_v28, %v180_v29 }
 0x15d   :  { %v185_v31 = vsel %vm184_vm11, %v182_v30, 0.0 }
 0x15e   :  { %v186_v32 = vrot.slane %v185_v31, 4 }
 0x15f   :  { %v175_v33 = vpop.f32.mrf.mxu1 }
 0x160   :  { %v187_v34 = vadd.f32 %v186_v32, %v185_v31  ;;  %v176_v35 = vadd.f32 %v315_v26, %v175_v33 }
 0x162   :  { %v188_v36 = vrot.slane %v187_v34, 2  ;;  %vm179_vm12 = vcmp.ge.f32.partialorder %v176_v35, 0.0  ;;  %v181_v37 = vmul.f32 0.01, %v176_v35 }
 0x164   :  { %v189_v38 = vadd.f32 %v188_v36, %v187_v34  ;;  %v183_v39 = vsel %vm179_vm12, %v176_v35, %v181_v37 }
 0x165   :  { %v192_v40 = vsel %vm184_vm11, %v183_v39, 0.0 }
 0x166   :  { %v190_v41 = vrot.slane %v189_v38, 1  ;;  %v193_v42 = vrot.slane %v192_v40, 4 }
 0x168   :  { %v194_v43 = vadd.f32 %v193_v42, %v192_v40  ;;  %v191_v44 = vadd.f32 %v190_v41, %v189_v38 }
 0x16a   :  { %v195_v45 = vrot.slane %v194_v43, 2  ;;  %v199_v47 = vmul.f32 %v191_v44, %v460_v46 }
 0x16c   :  { %v196_v48 = vadd.f32 %v195_v45, %v194_v43  ;;  %v201_v49 = vsub.f32 %v182_v30, %v199_v47 }
 0x16e   :  { %v197_v50 = vrot.slane %v196_v48, 1  ;;  %v203_v51 = vmul.f32 %v201_v49, %v201_v49 }
 0x170   :  { %v198_v52 = vadd.f32 %v197_v50, %v196_v48  ;;  %v205_v53 = vsel %vm184_vm11, %v203_v51, 0.0 }
 0x171   :  { %v206_v54 = vrot.slane %v205_v53, 4 }
 0x172   :  { %v200_v55 = vmul.f32 %v198_v52, %v460_v46 }
 0x173   :  { %v207_v56 = vadd.f32 %v206_v54, %v205_v53 }
 0x174   :  { %v202_v57 = vsub.f32 %v183_v39, %v200_v55 }
 0x175   :  { %v208_v58 = vrot.slane %v207_v56, 2 }
 0x176   :  { %v204_v59 = vmul.f32 %v202_v57, %v202_v57 }
 0x177   :  { %v209_v60 = vadd.f32 %v208_v58, %v207_v56 }
 0x178   :  { %v212_v61 = vsel %vm184_vm11, %v204_v59, 0.0 }
 0x179   :  { %v213_v62 = vrot.slane %v212_v61, 4  ;;  %v210_v63 = vrot.slane %v209_v60, 1 }
 0x17b   :  { %v214_v0 = vadd.f32 %v213_v62, %v212_v61  ;;  %v211_v1 = vadd.f32 %v210_v63, %v209_v60 }
 0x17d   :  { %v215_v2 = vrot.slane %v214_v0, 2  ;;  %v219_v3 = vmul.f32 0.14285715, %v211_v1 }
 0x17f   :  { %v216_v4 = vadd.f32 %v215_v2, %v214_v0  ;;  %322 = vrsqrt.f32 %v219_v3  ;;  %vm227_vm1 = vweird.f32 %v219_v3 }
 0x181   :  { %v217_v5 = vrot.slane %v216_v4, 1 }
 0x183   :  { %v218_v6 = vadd.f32 %v217_v5, %v216_v4 }
 0x185   :  { %v323_v7 = vpop.eup %322  ;;  %v220_v8 = vmul.f32 0.14285715, %v218_v6 }
 0x186   :  { %v222_v46 = vmul.f32 %v323_v7, %v219_v3  ;;  %vm228_vm15 = vweird.f32 %v323_v7 }
 0x187   :  { %324 = vrsqrt.f32 %v220_v8  ;;  %vm237_vm14 = vweird.f32 %v220_v8  ;;  %vm229_vm2 = vmor %vm227_vm1, %vm228_vm15 }
 0x188   :  { %v223_v9 = vmul.f32 %v323_v7, %v222_v46 }
 0x18a   :  { %v224_v12 = vmul.f32 0.5, %v223_v9 }
 0x18c   :  { %v225_v15 = vsub.f32 1.5, %v224_v12 }
 0x18d   :  { %v325_v10 = vpop.eup %324 }
 0x18e   :  { %v232_v11 = vmul.f32 %v325_v10, %v220_v8  ;;  %vm238_vm13 = vweird.f32 %v325_v10  ;;  %v226_v18 = vmul.f32 %v323_v7, %v225_v15 }
 0x18f   :  { %vm239_vm0 = vmor %vm237_vm14, %vm238_vm13 }
 0x190   :  { %v233_v13 = vmul.f32 %v325_v10, %v232_v11  ;;  %v230_v21 = vsel %vm229_vm2, %v323_v7, %v226_v18 }
 0x191   :  { %v241_v22 = vmul.f32 %v230_v21, %v201_v49 }
 0x192   :  { %v234_v14 = vmul.f32 0.5, %v233_v13 }
 0x194   :  { %v235_v16 = vsub.f32 1.5, %v234_v14 }
 0x196   :  { %v236_v17 = vmul.f32 %v325_v10, %v235_v16 }
 0x198   :  { %v240_v19 = vsel %vm239_vm0, %v325_v10, %v236_v17 }
 0x199   :  { %v242_v20 = vmul.f32 %v240_v19, %v202_v57 }
 0x19b   :  { %293 = vmatpush.xpose.msk.msra.mxu2 %vm184_vm11, %v242_v20 }
 0x19f   :  { %294 = vmatpush.xpose.msk.msra.mxu2 %vm184_vm11, %v241_v22 }
 0x1a2   :  { %295 = vmatmul.msk.f32.vlgmr.msra.gmra.mxu2 %vm184_vm11, %v243_v23 }
 0x225   :  { %v270_v24 = vpop.f32.mrf.mxu2 }
 0x226   :  { %274 = vst.msk [vmem:[#allocation2] sm:$0x1] %vm273_vm3, %v270_v24 }
 0x227   :  { %285 = dma.vmem_to_hbm [thread:$0]  %s281_s19, 16, %s283_s22, [#allocation3]  }
 0x228   :  { %350 = dma.done.wait [#allocation3], 16  }
 0x229   :  { %351 = vsyncadd [#allocation3], 4294967280 }
 0x22a   :  { %290 = vsyncpa [#allocation3], 1 }

</bundles_post_ra>
